<compile_context>
chip_gen: v7x
topology: tpu7x:2x2x1
jax: 0.10.0
libtpu: 0.0.40
codegen_flags: <defaults>
</compile_context>

<pallas_src>
import functools

import numpy as np
import jax
import jax.numpy as jnp
from jax.experimental import pallas as pl
from jax.experimental.pallas import tpu as pltpu


# ----------------------------------------------------------------------------
# Core Pallas kernels: tiled matmul, f32 accumulator in VMEM scratch.
#   bias variant : out = maybe_relu(A @ B + bias)   (convs, folded BN)
#   plain variant: out = A @ B                      (bilinear resize)
# ----------------------------------------------------------------------------
def _rup(v, m):
    return ((v + m - 1) // m) * m


def _mm_bias_kernel(a_ref, b_ref, bias_ref, o_ref, acc_ref, *, relu):
    @pl.when(pl.program_id(2) == 0)
    def _():
        acc_ref[...] = jnp.zeros_like(acc_ref)

    acc_ref[...] += jnp.dot(a_ref[...], b_ref[...],
                            preferred_element_type=jnp.float32)

    @pl.when(pl.program_id(2) == pl.num_programs(2) - 1)
    def _():
        out = acc_ref[...] + bias_ref[...]
        if relu:
            out = jnp.maximum(out, 0.0)
        o_ref[...] = out.astype(o_ref.dtype)


def _mm_plain_kernel(a_ref, b_ref, o_ref, acc_ref):
    @pl.when(pl.program_id(2) == 0)
    def _():
        acc_ref[...] = jnp.zeros_like(acc_ref)

    acc_ref[...] += jnp.dot(a_ref[...], b_ref[...],
                            preferred_element_type=jnp.float32)

    @pl.when(pl.program_id(2) == pl.num_programs(2) - 1)
    def _():
        o_ref[...] = acc_ref[...].astype(o_ref.dtype)


def _cost(a, b, out_dtype):
    Mp, Kp = a.shape
    Np = b.shape[1]
    flops = 2 * int(Mp) * int(Np) * int(Kp)
    bytes_accessed = int(a.size * a.dtype.itemsize + b.size * b.dtype.itemsize
                         + int(Mp) * int(Np) * jnp.dtype(out_dtype).itemsize)
    return pl.CostEstimate(flops=flops, transcendentals=0,
                           bytes_accessed=bytes_accessed)


_COMPILER_PARAMS = dict(
    dimension_semantics=("parallel", "parallel", "arbitrary"),
    vmem_limit_bytes=32 * 1024 * 1024,
)


@functools.partial(jax.jit, static_argnames=("tm", "tk", "tn", "relu", "out_dtype"))
def _matmul_bias(a, b, bias, *, tm, tk, tn, relu, out_dtype):
    Mp, Kp = a.shape
    Np = b.shape[1]
    grid = (Mp // tm, Np // tn, Kp // tk)
    return pl.pallas_call(
        functools.partial(_mm_bias_kernel, relu=relu),
        out_shape=jax.ShapeDtypeStruct((Mp, Np), out_dtype),
        grid=grid,
        in_specs=[
            pl.BlockSpec((tm, tk), lambda i, j, k: (i, k)),
            pl.BlockSpec((tk, tn), lambda i, j, k: (k, j)),
            pl.BlockSpec((1, tn), lambda i, j, k: (0, j)),
        ],
        out_specs=pl.BlockSpec((tm, tn), lambda i, j, k: (i, j)),
        scratch_shapes=[pltpu.VMEM((tm, tn), jnp.float32)],
        compiler_params=pltpu.CompilerParams(**_COMPILER_PARAMS),
        cost_estimate=_cost(a, b, out_dtype),
    )(a, b, bias)


@functools.partial(jax.jit, static_argnames=("tm", "tk", "tn", "out_dtype"))
def _matmul_plain(a, b, *, tm, tk, tn, out_dtype):
    Mp, Kp = a.shape
    Np = b.shape[1]
    grid = (Mp // tm, Np // tn, Kp // tk)
    return pl.pallas_call(
        _mm_plain_kernel,
        out_shape=jax.ShapeDtypeStruct((Mp, Np), out_dtype),
        grid=grid,
        in_specs=[
            pl.BlockSpec((tm, tk), lambda i, j, k: (i, k)),
            pl.BlockSpec((tk, tn), lambda i, j, k: (k, j)),
        ],
        out_specs=pl.BlockSpec((tm, tn), lambda i, j, k: (i, j)),
        scratch_shapes=[pltpu.VMEM((tm, tn), jnp.float32)],
        compiler_params=pltpu.CompilerParams(**_COMPILER_PARAMS),
        cost_estimate=_cost(a, b, out_dtype),
    )(a, b)


def _pick_tiles(M, K, N):
    # K padded to 128 (was 256) to cut MXU padding waste; tiles chosen to bound VMEM.
    Kp = _rup(K, 128)
    if Kp % 512 == 0:
        tk = 512
    elif Kp % 256 == 0:
        tk = 256
    else:
        tk = 128
    if M >= 256:
        tm = 256
        Mp = _rup(M, tm)
    else:
        tm = _rup(M, 32)      # multiple of 32 keeps bf16 sublane tiling happy
        Mp = tm
    Np = _rup(N, 128)
    tn = 256 if (Np % 256 == 0) else 128
    return Mp, Kp, Np, tm, tk, tn


def fused_matmul(a, b, bias=None, relu=False,
                 out_dtype=jnp.bfloat16, operand_dtype=jnp.bfloat16):
    """maybe_relu(a @ b + bias); bias broadcast over rows (or no epilogue if bias is None)."""
    M, K = a.shape
    K2, N = b.shape
    assert K == K2
    Mp, Kp, Np, tm, tk, tn = _pick_tiles(M, K, N)
    a_p = jnp.pad(a.astype(operand_dtype), ((0, Mp - M), (0, Kp - K)))
    b_p = jnp.pad(b.astype(operand_dtype), ((0, Kp - K), (0, Np - N)))
    if bias is None:
        out = _matmul_plain(a_p, b_p, tm=tm, tk=tk, tn=tn, out_dtype=out_dtype)
    else:
        bias_p = jnp.pad(bias.astype(jnp.float32).reshape(1, N), ((0, 0), (0, Np - N)))
        out = _matmul_bias(a_p, b_p, bias_p, tm=tm, tk=tk, tn=tn,
                           relu=relu, out_dtype=out_dtype)
    return out[:M, :N]


# ----------------------------------------------------------------------------
# Glue: im2col (bf16), VPU avg-pool, separable bilinear resize via matmul
# ----------------------------------------------------------------------------
def _im2col(x, kh, kw, stride, pad):
    N, H, W, C = x.shape
    if pad > 0:
        x = jnp.pad(x, ((0, 0), (pad, pad), (pad, pad), (0, 0)))
    Ho = (H + 2 * pad - kh) // stride + 1
    Wo = (W + 2 * pad - kw) // stride + 1
    cols = []
    for i in range(kh):
        for j in range(kw):
            cols.append(x[:, i:i + stride * Ho:stride, j:j + stride * Wo:stride, :])
    a = jnp.concatenate(cols, axis=-1) if len(cols) > 1 else cols[0]
    return a.reshape(N * Ho * Wo, kh * kw * C), (N, Ho, Wo)


@functools.partial(jax.jit, static_argnames=("kernel", "stride", "relu", "out_dtype"))
def _conv2d_fused(x, w2d, bias, *, kernel, stride, relu, out_dtype):
    a, (N, Ho, Wo) = _im2col(x, kernel, kernel, stride, kernel // 2)
    out = fused_matmul(a, w2d, bias=bias, relu=relu, out_dtype=out_dtype)
    return out.reshape(N, Ho, Wo, -1)


def avg_pool_2x2(x):
    # VPU reshape-and-mean (no MXU work, no transposes).
    N, H, W, C = x.shape
    y = x.reshape(N, H // 2, 2, W // 2, 2, C).astype(jnp.float32)
    y = y.mean(axis=(2, 4))
    return y.astype(x.dtype)


_matrix_cache = {}


def _interp_matrix(s_out, s_in):
    key = (s_out, s_in)
    if key not in _matrix_cache:
        A = np.zeros((s_out, s_in), np.float32)
        for o in range(s_out):
            src = 0.0 if s_out == 1 else o * (s_in - 1) / (s_out - 1)
            lo = int(np.floor(src))
            hi = min(lo + 1, s_in - 1)
            frac = src - lo
            A[o, lo] += 1.0 - frac
            A[o, hi] += frac
        _matrix_cache[key] = jnp.asarray(A)
    return _matrix_cache[key]


def _operand_dtype_for(x):
    return jnp.float32 if x.dtype == jnp.float32 else jnp.bfloat16


def _apply_matrix_H(A, x):
    N, H, W, C = x.shape
    Ho = A.shape[0]
    xm = jnp.transpose(x, (1, 0, 2, 3)).reshape(H, N * W * C)
    out = fused_matmul(A, xm, bias=None, relu=False,
                       out_dtype=x.dtype, operand_dtype=_operand_dtype_for(x))
    return jnp.transpose(out.reshape(Ho, N, W, C), (1, 0, 2, 3))


def _apply_matrix_W(A, x):
    N, H, W, C = x.shape
    Wo = A.shape[0]
    xm = jnp.transpose(x, (2, 0, 1, 3)).reshape(W, N * H * C)
    out = fused_matmul(A, xm, bias=None, relu=False,
                       out_dtype=x.dtype, operand_dtype=_operand_dtype_for(x))
    return jnp.transpose(out.reshape(Wo, N, H, C), (1, 2, 0, 3))


def bilinear_resize_align_corners(x, Ho, Wo):
    _, H, W, _ = x.shape
    if Ho != H:
        x = _apply_matrix_H(_interp_matrix(Ho, H), x)
    if Wo != W:
        x = _apply_matrix_W(_interp_matrix(Wo, W), x)
    return x


# ----------------------------------------------------------------------------
# Module construction (mirrors the PyTorch hardnet.__init__ exactly)
# ----------------------------------------------------------------------------
def make_conv_layer(key, cin, cout, kernel=3, stride=1):
    # Conv(bias=False) + BatchNorm(eval, folded into weights) + ReLU
    k1, k2, k3, k4, k5 = jax.random.split(key, 5)
    fan_in = kernel * kernel * cin
    w = jax.random.normal(k1, (kernel, kernel, cin, cout), jnp.float32) * np.sqrt(2.0 / fan_in)
    gamma = 1.0 + 0.1 * jax.random.uniform(k2, (cout,), jnp.float32)
    beta = 0.05 * jax.random.normal(k3, (cout,), jnp.float32)
    run_mean = 0.05 * jax.random.normal(k4, (cout,), jnp.float32)
    run_var = 1.0 + 0.1 * jax.random.uniform(k5, (cout,), jnp.float32)
    eps = 1e-5
    scale = gamma / jnp.sqrt(run_var + eps)
    bias = beta - run_mean * scale
    # Fold BN scale into the weights; pre-reshape to 2-D and pre-cast to bf16.
    w2d = (w * scale[None, None, None, :]).reshape(kernel * kernel * cin, cout)
    return dict(kind="conv", kernel=kernel, stride=stride,
                w2d=w2d.astype(jnp.bfloat16), bias=bias.astype(jnp.float32))


def get_link(layer, base_ch, growth_rate, grmul):
    if layer == 0:
        return base_ch, 0, []
    out_channels = growth_rate
    link = []
    for i in range(10):
        dv = 2 ** i
        if layer % dv == 0:
            k = layer - dv
            link.append(k)
            if i > 0:
                out_channels *= grmul
    out_channels = int(int(out_channels + 1) / 2) * 2
    in_channels = 0
    for i in link:
        ch, _, _ = get_link(i, base_ch, growth_rate, grmul)
        in_channels += ch
    return out_channels, in_channels, link


def make_hard_block(key, in_channels, growth_rate, grmul, n_layers):
    links, layers = [], []
    out_channels = 0
    for i in range(n_layers):
        outch, inch, link = get_link(i + 1, in_channels, growth_rate, grmul)
        links.append(link)
        layers.append(make_conv_layer(jax.random.fold_in(key, i), inch, outch,
                                      kernel=3, stride=1))
        if i % 2 == 0 or i == n_layers - 1:
            out_channels += outch
    return dict(kind="block", links=links, layers=layers, out_channels=out_channels)


def build_hardnet_params(key, n_classes=19):
    first_ch = [16, 24, 32, 48]
    ch_list = [64, 96, 160, 224, 320]
    grmul = 1.7
    gr = [10, 16, 18, 24, 32]
    n_layers = [4, 4, 8, 8, 8]
    blks = len(n_layers)

    counter = [0]

    def kg():
        k = jax.random.fold_in(key, counter[0])
        counter[0] += 1
        return k

    base = []
    shortcut_layers = []
    base.append(make_conv_layer(kg(), 3, first_ch[0], kernel=3, stride=2))
    base.append(make_conv_layer(kg(), first_ch[0], first_ch[1], kernel=3, stride=1))
    base.append(make_conv_layer(kg(), first_ch[1], first_ch[2], kernel=3, stride=2))
    base.append(make_conv_layer(kg(), first_ch[2], first_ch[3], kernel=3, stride=1))

    skip_counts = []
    ch = first_ch[3]
    for i in range(blks):
        blk = make_hard_block(kg(), ch, gr[i], grmul, n_layers[i])
        ch = blk["out_channels"]
        skip_counts.append(ch)
        base.append(blk)
        if i < blks - 1:
            shortcut_layers.append(len(base) - 1)
        base.append(make_conv_layer(kg(), ch, ch_list[i], kernel=1, stride=1))
        ch = ch_list[i]
        if i < blks - 1:
            base.append(dict(kind="pool"))

    n_blocks = blks - 1
    prev = ch
    conv1x1_up, dense_up = [], []
    for i in range(n_blocks - 1, -1, -1):
        cur = prev + skip_counts[i]
        conv1x1_up.append(make_conv_layer(kg(), cur, cur // 2, kernel=1, stride=1))
        cur = cur // 2
        blk = make_hard_block(kg(), cur, gr[i], grmul, n_layers[i])
        dense_up.append(blk)
        prev = blk["out_channels"]
        cur = prev

    kfw, kfb = jax.random.split(kg())
    final = dict(
        w2d=(jax.random.normal(kfw, (cur, n_classes), jnp.float32)
             / np.sqrt(cur)).astype(jnp.bfloat16),
        b=0.01 * jax.random.normal(kfb, (n_classes,), jnp.float32),
    )
    return dict(base=base, shortcut_layers=shortcut_layers, n_blocks=n_blocks,
                conv1x1_up=conv1x1_up, denseBlocksUp=dense_up, finalConv=final)


# ----------------------------------------------------------------------------
# Forward pass (mirrors hardnet.forward)
# ----------------------------------------------------------------------------
def apply_conv_layer(p, x):
    return _conv2d_fused(x, p["w2d"], p["bias"], kernel=p["kernel"],
                         stride=p["stride"], relu=True, out_dtype=jnp.bfloat16)


def apply_hard_block(blk, x, keep_base=False):
    layers_ = [x]
    for li in range(len(blk["layers"])):
        link = blk["links"][li]
        tin = [layers_[i] for i in link]
        xin = jnp.concatenate(tin, axis=-1) if len(tin) > 1 else tin[0]
        layers_.append(apply_conv_layer(blk["layers"][li], xin))
    t = len(layers_)
    outs = [layers_[i] for i in range(t)
            if (i == 0 and keep_base) or i == t - 1 or i % 2 == 1]
    return jnp.concatenate(outs, axis=-1)


def apply_final_conv(fc, x):
    return _conv2d_fused(x, fc["w2d"], fc["b"], kernel=1, stride=1,
                         relu=False, out_dtype=jnp.float32)


def hardnet_forward(params, x_nchw):
    size_in = x_nchw.shape  # (N, C, H, W)
    x = jnp.transpose(x_nchw, (0, 2, 3, 1)).astype(jnp.bfloat16)  # -> NHWC, bf16
    skips = []
    for i, mod in enumerate(params["base"]):
        if mod["kind"] == "conv":
            x = apply_conv_layer(mod, x)
        elif mod["kind"] == "block":
            x = apply_hard_block(mod, x)
        else:  # avg pool 2x2 stride 2
            x = avg_pool_2x2(x)
        if i in params["shortcut_layers"]:
            skips.append(x)

    out = x
    for i in range(params["n_blocks"]):
        skip = skips.pop()
        # TransitionUp: bilinear align_corners=True to skip size, then concat
        up = bilinear_resize_align_corners(out, skip.shape[1], skip.shape[2])
        out = jnp.concatenate([up, skip], axis=-1)
        out = apply_conv_layer(params["conv1x1_up"][i], out)
        out = apply_hard_block(params["denseBlocksUp"][i], out)

    out = apply_final_conv(params["finalConv"], out)                 # f32 logits
    out = bilinear_resize_align_corners(out, size_in[2], size_in[3])  # f32 resize
    return jnp.transpose(out, (0, 3, 1, 2)).astype(jnp.float32)       # back to NCHW


# ----------------------------------------------------------------------------
if __name__ == "__main__":
    root = jax.random.PRNGKey(0)
    # smallest spatial size that survives the 64x downsampling path is 64
    params = build_hardnet_params(jax.random.fold_in(root, 0), n_classes=19)
    x = jax.random.normal(jax.random.fold_in(root, 1), (1, 3, 64, 64), jnp.float32)

    out = hardnet_forward(params, x)
    out = jax.block_until_ready(out)

    assert out.shape == (1, 19, 64, 64), out.shape
    assert bool(jnp.all(jnp.isfinite(out)))
    print("KERNEL_OK")
</pallas_src>

<mosaic_0001>
module attributes {stable_mosaic.version = 11 : i64} {
  func.func @_mm_bias_kernel(%arg0: i32, %arg1: i32, %arg2: i32, %arg3: memref<256x128xbf16, #tpu.memory_space<vmem>>, %arg4: memref<128x128xbf16, #tpu.memory_space<vmem>>, %arg5: memref<1x128xf32, #tpu.memory_space<vmem>>, %arg6: memref<256x128xbf16, #tpu.memory_space<vmem>>, %arg7: memref<256x128xf32, #tpu.memory_space<vmem>>) attributes {dimension_semantics = [#tpu.dimension_semantics<parallel>, #tpu.dimension_semantics<parallel>, #tpu.dimension_semantics<arbitrary>], iteration_bounds = array<i64: 4, 1, 1>, scalar_prefetch = 0 : i64, scratch_operands = 1 : i64, tpu.core_type = #tpu.core_type<tc>, window_params = [{transform_indices = @transform_0, window_bounds = array<i64: 256, 128>}, {transform_indices = @transform_1, window_bounds = array<i64: 128, 128>}, {transform_indices = @transform_2, window_bounds = array<i64: 1, 128>}, {transform_indices = @transform_3, window_bounds = array<i64: 256, 128>}]} {
    %c0_i32 = arith.constant 0 : i32
    %0 = arith.cmpi eq, %arg2, %c0_i32 : i32
    %1 = arith.extui %0 : i1 to i32
    %c0_i32_0 = arith.constant 0 : i32
    %2 = arith.cmpi ne, %1, %c0_i32_0 : i32
    scf.if %2 {
      %cst_10 = arith.constant 0.000000e+00 : f32
      %12 = vector.broadcast %cst_10 : f32 to vector<256x128xf32>
      %c0_11 = arith.constant 0 : index
      %c0_12 = arith.constant 0 : index
      %13 = vector.load %arg7[%c0_11, %c0_12] : memref<256x128xf32, #tpu.memory_space<vmem>>, vector<256x128xf32>
      tpu.vector_store %arg7[%c0_11, %c0_12], %12 {strides = array<i32>} : memref<256x128xf32, #tpu.memory_space<vmem>>, vector<256x128xf32>,
    } else {
    }
    %c0 = arith.constant 0 : index
    %c0_1 = arith.constant 0 : index
    %3 = vector.load %arg7[%c0, %c0_1] : memref<256x128xf32, #tpu.memory_space<vmem>>, vector<256x128xf32>
    %c0_2 = arith.constant 0 : index
    %c0_3 = arith.constant 0 : index
    %4 = vector.load %arg3[%c0_2, %c0_3] : memref<256x128xbf16, #tpu.memory_space<vmem>>, vector<256x128xbf16>
    %c0_4 = arith.constant 0 : index
    %c0_5 = arith.constant 0 : index
    %5 = vector.load %arg4[%c0_4, %c0_5] : memref<128x128xbf16, #tpu.memory_space<vmem>>, vector<128x128xbf16>
    %cst = arith.constant dense<0.000000e+00> : vector<256x128xf32>
    %6 = tpu.matmul %4, %5, %cst {dimension_numbers = #tpu.dot_dimension_numbers<[1], [0], [0], [1], [0, 0, 1, 1], [], []>} : vector<256x128xbf16>, vector<128x128xbf16>, vector<256x128xf32> -> vector<256x128xf32>
    %7 = arith.addf %3, %6 : vector<256x128xf32>
    %c0_6 = arith.constant 0 : index
    %c0_7 = arith.constant 0 : index
    %8 = vector.load %arg7[%c0_6, %c0_7] : memref<256x128xf32, #tpu.memory_space<vmem>>, vector<256x128xf32>
    tpu.vector_store %arg7[%c0_6, %c0_7], %7 {strides = array<i32>} : memref<256x128xf32, #tpu.memory_space<vmem>>, vector<256x128xf32>,
    %c0_i32_8 = arith.constant 0 : i32
    %9 = arith.cmpi eq, %arg2, %c0_i32_8 : i32
    %10 = arith.extui %9 : i1 to i32
    %c0_i32_9 = arith.constant 0 : i32
    %11 = arith.cmpi ne, %10, %c0_i32_9 : i32
    scf.if %11 {
      %c0_10 = arith.constant 0 : index
      %c0_11 = arith.constant 0 : index
      %12 = vector.load %arg7[%c0_10, %c0_11] : memref<256x128xf32, #tpu.memory_space<vmem>>, vector<256x128xf32>
      %c0_12 = arith.constant 0 : index
      %c0_13 = arith.constant 0 : index
      %13 = vector.load %arg5[%c0_12, %c0_13] : memref<1x128xf32, #tpu.memory_space<vmem>>, vector<1x128xf32>
      %14 = vector.broadcast %13 : vector<1x128xf32> to vector<256x128xf32>
      %15 = arith.addf %12, %14 : vector<256x128xf32>
      %cst_14 = arith.constant 0.000000e+00 : f32
      %16 = vector.broadcast %cst_14 : f32 to vector<256x128xf32>
      %17 = arith.maximumf %15, %16 : vector<256x128xf32>
      %18 = arith.truncf %17 : vector<256x128xf32> to vector<256x128xbf16>
      %c0_15 = arith.constant 0 : index
      %c0_16 = arith.constant 0 : index
      %19 = vector.load %arg6[%c0_15, %c0_16] : memref<256x128xbf16, #tpu.memory_space<vmem>>, vector<256x128xbf16>
      tpu.vector_store %arg6[%c0_15, %c0_16], %18 {strides = array<i32>} : memref<256x128xbf16, #tpu.memory_space<vmem>>, vector<256x128xbf16>,
    } else {
    }
    return
  }
  func.func @transform_0(%arg0: i32, %arg1: i32, %arg2: i32) -> (i32, i32) {
    %c0_i32 = arith.constant 0 : i32
    return %arg0, %arg2 : i32, i32
  }
  func.func @transform_1(%arg0: i32, %arg1: i32, %arg2: i32) -> (i32, i32) {
    %c0_i32 = arith.constant 0 : i32
    return %arg2, %arg1 : i32, i32
  }
  func.func @transform_2(%arg0: i32, %arg1: i32, %arg2: i32) -> (i32, i32) {
    %c0_i32 = arith.constant 0 : i32
    %c0_i32_0 = arith.constant 0 : i32
    return %c0_i32, %arg1 : i32, i32
  }
  func.func @transform_3(%arg0: i32, %arg1: i32, %arg2: i32) -> (i32, i32) {
    %c0_i32 = arith.constant 0 : i32
    return %arg0, %arg1 : i32, i32
  }
}

</mosaic_0001>

<bundles_post_ra>
// kernel: _matmul_bias.1
= control target key start
LH: loop header
LB: loop body
LE: loop exit
PB: predicated region body
PF: predicated region fallthrough
CT: control target
= control target key end

     0   :  { %8 = vsyncpa [#allocation4], 0  ;;  %s2004_s0 = inlined_call_operand.hbm [shape: bf16[1024,128], index: 0, kind: input, shape index: {}]   ;;  %s2005_s1 = inlined_call_operand.hbm [shape: bf16[128,128], index: 1, kind: input, shape index: {}]   ;;  %s2006_s2 = inlined_call_operand.vmem [shape: f32[1,128], index: 2, kind: input, shape index: {}]   ;;  %s2007_s3 = inlined_call_operand.hbm [shape: bf16[1024,128], index: 3, kind: output, shape index: {}]  }
   0x1   :  { %10 = vsyncpa [#allocation4 + $0x1], 0 }
   0x2   :  { %11 = vsyncpa [#allocation7], 0 }
   0x3   :  { %12 = vsyncpa [#allocation5], 0 }
   0x4   :  { %14 = vsyncpa [#allocation5 + $0x1], 0  ;;  %s1703_s12 = smov 0   ;;  %s1705_s13 = smov 0  }
   0x5   :  { %s1707_s14 = smov 0   ;;  %s1709_s15 = smov 0  }
   0x6   :  { %s1711_s16 = smov 0   ;;  %s1713_s17 = smov 0  }
   0x7 LB: > { %s1137_s18 = sadd.s32 4294967295, %s1674_s17   ;;  %s1138_s19 = sadd.s32 4294967294, %s1674_s17   ;;  %s1674_s17 = sphi %s1713_s17, %s20_s17   ;;  %s1670_s16 = sphi %s1711_s16, %s2030_s16   ;;  %s1666_s15 = sphi %s1709_s15, %s2029_s15   ;;  %s1662_s14 = sphi %s1707_s14, %s2028_s14   ;;  %s1658_s13 = sphi %s1705_s13, %s2027_s13   ;;  %s1654_s12 = sphi %s1703_s12, %s2026_s12  }
   0x8   : > { %p61_p0 = scmp.ne.s32.totalorder %s1658_s13, %s1654_s12  ;;  %p1737_p1 = scmp.eq.s32.totalorder %s1137_s18, 0 }
   0x9   : > { %p1741_p2 = scmp.eq.s32.totalorder %s1137_s18, 3  ;;  %p147_p3 = scmp.eq.s32.totalorder %s1138_s19, 3 }
   0xa   : > { %s2012_s20 = scalar_select %p1737_p1, 1, 0 }
   0xb   : > { %s2013_s21 = scalar_select %p1741_p2, 1, 0 }
   0xc   : > { %p1747_p4 = por %p1737_p1, %p61_p0  ;;  %p1139_p5 = scmp.ge.s32.totalorder %s1674_s17, 1 }
   0xd   : > { %p1752_p6 = por %p147_p3, %p61_p0  ;;  %p154_p7 = scmp.lt.s32.totalorder %s1674_s17, 5 }
   0xe   : > { %s2014_s22 = scalar_select %p1747_p4, 1, 0 }
   0xf   : > { %s2015_s23 = scalar_select %p1752_p6, 1, 0 }
  0x10   : > { %p1757_p8 = pnand %p1139_p5, %p154_p7  ;;  %s1676_s25 = smov [#allocation6]  }
  0x11   : > { %s170_s26 = sshll.u32 %s1676_s25, 4  ;;  %s39_s28 = sadd.s32 1, %s1670_s16  ;;  %s171_s26 = int_to_ptr.vmem [resolvable:$true] %s170_s26 }
  0x12   : > { %s2016_s24 = scalar_select %p1757_p8, 1, 0 }
  0x13   : > { %p1437_p9 = pneg %p1757_p8  ;;  %s1530_s4 = scalar_lea.hbm %s2005_s1, 1024 }
  0x14   : > { %p1531_p11 = scmp.ne.s32.totalorder %s2005_s1, %s1530_s4  ;;  %p1537_p3 = scmp.lt.u32.totalorder %s1530_s4, %s2005_s1 }
  0x15   : > { %p1765_p10 = pnand %p1437_p9, %p1737_p1 }
  0x17   : > { %p1532_p12 = pneg %p1765_p10 }
  0x19   : > { %p1533_p13 = pnand %p1532_p12, %p1531_p11 }
  0x1b   : > { %p1534_p0 = pneg %p1533_p13 }
  0x1d   : > { %p1539_p5 = pnand %p1537_p3, %p1534_p0 }
  0x1f   : > { %1542 = shalt.err (!%p1539_p5)
}
  0x20   : > { %s1543_s9 = scalar_lea.vmem %s171_s26, 1024  ;;  %p1551_p1 = scmp.lt.s32.totalorder %s171_s26, %s171_s26 }
  0x21   : > { %p1544_p7 = scmp.ne.s32.totalorder %s171_s26, %s1543_s9  ;;  %p1552_p4 = scmp.lt.s32.totalorder %s1543_s9, %s1543_s9 }
  0x23   : > { %p1546_p9 = pnand %p1544_p7, %p1532_p12  ;;  %p1553_p8 = por %p1552_p4, %p1551_p1 }
  0x25   : > { %p1547_p6 = pneg %p1546_p9 }
  0x27   : > { %p1554_p2 = pnand %p1553_p8, %p1547_p6 }
  0x29   : > { %1557 = shalt.err (!%p1554_p2)
}
  0x2a   : > { %s1677_s10 = smov 64   ;;  %s1678_s11 = smov 4  }
  0x2b   : > { %1440 = dma.hbm_to_vmem [thread:$0]  (!%p1765_p10), %s2005_s1, 1024, %s171_s26, [#allocation7], %s1677_s10, %s1677_s10, %s1678_s11  }
  0x2c   : > { %p41_p1 = scmp.ge.s32.totalorder %s39_s28, 4  ;;  %s48_s25 = sadd.s32 1, %s1662_s14 }
  0x2d   : > { %p55_p2 = scmp.ne.s32.totalorder %s1662_s14, %s1658_s13  ;;  %p56_p4 = scmp.eq.s32.totalorder %s1674_s17, 0 }
  0x2e   : > { %s2032_s28 = smov (%p41_p1, %s39_s28), 0  ;;  %p2019_p8 = scmp.ne.s32.totalorder %s2013_s21, 0 }
  0x2f   : > { %p1795_p6 = por %p56_p4, %p55_p2  ;;  %s43_s30 = ssub.s32 %s1670_s16, %s2032_s28 }
  0x30   : > { %p1801_p11 = por %p2019_p8, %p55_p2  ;;  %p1450_p12 = scmp.lt.s32.totalorder %s1674_s17, 4 }
  0x31   : > { %p46_p10 = scmp.eq.s32.totalorder %s43_s30, 0  ;;  %s190_s26 = sand.u32 1, %s1662_s14  }
  0x32   : > { %s1143_s4 = sshll.u32 %s190_s26, 7  ;;  %s1212_s6 = sshll.u32 %s1670_s16, 11 }
  0x33   : > { %s1810_s5 = scalar_select %p46_p10, %s1662_s14, %s48_s25  }
  0x34   : > { %s1816_s9 = scalar_lea.hbm %s2004_s0, %s1212_s6  ;;  %s194_s21 = scalar_lea.vmem [#allocation3], %s1143_s4 }
  0x35   : > { %s202_s18 = sshll.u32 %s194_s21, 4  ;;  %p1822_p13 = pnand %p1450_p12, %p1795_p6  ;;  %s1818_s18 = int_to_ptr.vmem [resolvable:$true] %s202_s18 }
  0x36   : > { %s1826_s25 = scalar_lea.sflag [#allocation4], %s190_s26  ;;  %s1558_s30 = scalar_lea.hbm %s1816_s9, 2048 }
  0x37   : > { %p1559_p0 = scmp.ne.s32.totalorder %s1816_s9, %s1558_s30  ;;  %p1560_p3 = pneg %p1822_p13 }
  0x38   : > { %s1563_s29 = scalar_lea.hbm %s2004_s0, 8192  ;;  %p1564_p9 = scmp.lt.u32.totalorder %s1816_s9, %s2004_s0 }
  0x39   : > { %p1561_p5 = pnand %p1560_p3, %p1559_p0  ;;  %p1565_p1 = scmp.lt.u32.totalorder %s1563_s29, %s1558_s30 }
  0x3a   : > { %p1567_p4 = scmp.lt.u32.totalorder %s1558_s30, %s1816_s9 }
  0x3b   : > { %p1562_p7 = pneg %p1561_p5  ;;  %p1566_p2 = por %p1565_p1, %p1564_p9 }
  0x3d   : > { %p1568_p6 = por %p1567_p4, %p1566_p2 }
  0x3f   : > { %p1569_p8 = pnand %p1568_p6, %p1562_p7 }
  0x41   : > { %1572 = shalt.err (!%p1569_p8)
}
  0x42   : > { %s1573_s26 = scalar_lea.vmem %s1818_s18, 2048  ;;  %s1679_s21 = smov [#allocation3]  }
  0x43   : > { %p1574_p12 = scmp.ne.s32.totalorder %s1818_s18, %s1573_s26  ;;  %s1578_s4 = sshll.u32 %s1679_s21, 4  ;;  %s1579_s4 = int_to_ptr.vmem [resolvable:$false] %s1578_s4 }
  0x44   : > { %s1580_s6 = scalar_lea.vmem %s1579_s4, 4096  ;;  %p1581_p5 = scmp.lt.s32.totalorder %s1818_s18, %s1579_s4 }
  0x45   : > { %p1576_p10 = pnand %p1574_p12, %p1560_p3  ;;  %p1582_p9 = scmp.lt.s32.totalorder %s1580_s6, %s1573_s26 }
  0x47   : > { %p1577_p0 = pneg %p1576_p10  ;;  %p1583_p1 = por %p1582_p9, %p1581_p5 }
  0x49   : > { %p1584_p2 = pnand %p1583_p1, %p1577_p0 }
  0x4b   : > { %1587 = shalt.err (!%p1584_p2)
}
  0x4c   : > { %1444 = dma.hbm_to_vmem [thread:$0]  (!%p1822_p13), %s1816_s9, 2048, %s1818_s18, %s1826_s25, %s1677_s10, %s1677_s10, %s1678_s11  }
  0x4d   : > { %p2022_p3 = scmp.ne.s32.totalorder %s2016_s24, 0 }
  0x4e   : > { %s1860_s30 = sand.u32 (!%p2022_p3), 1, %s1658_s13   ;;  %p2023_p7 = scmp.ne.s32.totalorder (!%p2022_p3), %s2014_s22, 0 }
  0x4f   : > { %214 = sbr.rel (%p2022_p3) target bundleno = 383 (0x17f), region = 32  ;;  %s1147_s29 = sshll.u32 (!%p2022_p3), %s1860_s30, 7 }
  0x50   : > { %s217_s7 = scalar_lea.sflag (!%p2022_p3), [#allocation4], %s1860_s30  ;;  %s1866_s19 = scalar_lea.vmem (!%p2022_p3), [#allocation3], %s1147_s29 }
  0x56   : > { %1641 = dma.done.wait (%p2023_p7), %s217_s7, 2048  }
  0x57   : > { %1643 = vsyncadd (%p2023_p7), %s217_s7, 4294965248  ;;  %p2024_p13 = scmp.ne.s32.totalorder %s2012_s20, 0 }
  0x59   : > { %1645 = dma.done.wait (%p2024_p13), [#allocation7], 1024  }
  0x5a   : > { %1647 = vsyncadd (%p2024_p13), [#allocation7], 4294966272  ;;  %v1506_v0 = vld [vmem:[#allocation6] sm:$0xff]   ;;  %v1507_v1 = vld [vmem:[#allocation6 + $0x8] sm:$0xff]   ;;  %s1907_s24 = scalar_lea.vmem [#allocation8], %s1147_s29  ;;  %s1245_s10 = sshll.u32 %s1666_s15, 11 }
  0x5b   : > { %1365 = vmatprep.subr.bf16.mxu0 %v1506_v0  ;;  %1413 = vmatprep.subr.bf16.mxu1 %v1506_v0  ;;  %v1508_v2 = vld [vmem:[#allocation6 + $0x10] sm:$0xff]   ;;  %v1509_v3 = vld [vmem:[#allocation6 + $0x18] sm:$0xff]   ;;  %v1514_v4 = vld [vmem:[%s1866_s19] sm:$0xff]   ;;  %s1023_s11 = sshll.u32 %s1907_s24, 4  ;;  %s1950_s15 = scalar_lea.hbm %s2007_s3, %s1245_s10  ;;  %s1952_s11 = int_to_ptr.vmem [resolvable:$true] %s1023_s11 }
  0x5c   : > { %1366 = vmatpush3.bf16.msra.mxu0 %v1506_v0  ;;  %1421 = vmatpush3.bf16.msra.mxu1 %v1506_v0  ;;  %v1515_v5 = vld [vmem:[%s1866_s19 + $0x40] sm:$0xff]   ;;  %v1511_v7 = vld [vmem:[#allocation6 + $0x28] sm:$0xff]   ;;  %v1512_v8 = vld [vmem:[#allocation6 + $0x30] sm:$0xff]   ;;  %s1009_s25 = scalar_lea.sflag [#allocation5], %s1860_s30  ;;  %s1588_s8 = scalar_lea.vmem %s1952_s11, 2048 }
  0x5d   : > { %1367 = vmatprep.subr.bf16.mxu0 %v1507_v1  ;;  %1414 = vmatprep.subr.bf16.mxu1 %v1507_v1  ;;  %v1510_v6 = vld [vmem:[#allocation6 + $0x20] sm:$0xff]   ;;  %v1513_v9 = vld [vmem:[#allocation6 + $0x38] sm:$0xff]   ;;  %v1516_v10 = vld [vmem:[%s1866_s19 + $0x8] sm:$0xff]   ;;  %p1589_p4 = scmp.ne.s32.totalorder %s1952_s11, %s1588_s8  ;;  %s1680_s26 = smov [#allocation8]  }
  0x5e   : > { %1381 = vmatprep.mubr.bf16.mxu0 %v1514_v4  ;;  %1397 = vmatprep.mubr.bf16.mxu1 %v1515_v5  ;;  %v1517_v11 = vld [vmem:[%s1866_s19 + $0x48] sm:$0xff]   ;;  %v1518_v12 = vld [vmem:[%s1866_s19 + $0x10] sm:$0xff]   ;;  %v1520_v14 = vld [vmem:[%s1866_s19 + $0x18] sm:$0xff]   ;;  %s1592_s21 = sshll.u32 %s1680_s26, 4  ;;  %s1593_s21 = int_to_ptr.vmem [resolvable:$false] %s1592_s21 }
  0x5f   : > { %v1519_v13 = vld [vmem:[%s1866_s19 + $0x50] sm:$0xff]   ;;  %v1521_v15 = vld [vmem:[%s1866_s19 + $0x58] sm:$0xff]   ;;  %v1522_v16 = vld [vmem:[%s1866_s19 + $0x20] sm:$0xff]   ;;  %p1590_p6 = pnand %p1589_p4, %p1801_p11  ;;  %s1594_s4 = scalar_lea.vmem %s1593_s21, 4096 }
  0x60   : > { %1368 = vmatpush3.bf16.msra.mxu0 %v1507_v1  ;;  %1422 = vmatpush3.bf16.msra.mxu1 %v1507_v1  ;;  %v1523_v17 = vld [vmem:[%s1866_s19 + $0x60] sm:$0xff]   ;;  %v1524_v18 = vld [vmem:[%s1866_s19 + $0x28] sm:$0xff]   ;;  %v1526_v20 = vld [vmem:[%s1866_s19 + $0x30] sm:$0xff]   ;;  %p1595_p12 = scmp.lt.s32.totalorder %s1952_s11, %s1593_s21  ;;  %p1596_p10 = scmp.lt.s32.totalorder %s1594_s4, %s1588_s8 }
  0x61   : > { %1369 = vmatprep.subr.bf16.mxu0 %v1508_v2  ;;  %1415 = vmatprep.subr.bf16.mxu1 %v1508_v2  ;;  %v1525_v19 = vld [vmem:[%s1866_s19 + $0x68] sm:$0xff]   ;;  %v1527_v21 = vld [vmem:[%s1866_s19 + $0x70] sm:$0xff]   ;;  %v1528_v22 = vld [vmem:[%s1866_s19 + $0x38] sm:$0xff]   ;;  %p1591_p8 = pneg %p1590_p6 }
  0x62   : > { %v1529_v23 = vld [vmem:[%s1866_s19 + $0x78] sm:$0xff]   ;;  %v1895_v24 = vld [vmem:[%s2006_s2] ss:$0 sm:$0xff]  ;;  %p1597_p0 = por %p1596_p10, %p1595_p12 }
  0x64   : > { %1370 = vmatpush3.bf16.msra.mxu0 %v1508_v2  ;;  %1423 = vmatpush3.bf16.msra.mxu1 %v1508_v2  ;;  %p1598_p5 = pnand %p1597_p0, %p1591_p8 }
  0x65   : > { %1371 = vmatprep.subr.bf16.mxu0 %v1509_v3  ;;  %1416 = vmatprep.subr.bf16.mxu1 %v1509_v3 }
  0x68   : > { %1372 = vmatpush3.bf16.msra.mxu0 %v1509_v3  ;;  %1424 = vmatpush3.bf16.msra.mxu1 %v1509_v3 }
  0x69   : > { %1373 = vmatprep.subr.bf16.mxu0 %v1510_v6  ;;  %1417 = vmatprep.subr.bf16.mxu1 %v1510_v6 }
  0x6c   : > { %1374 = vmatpush3.bf16.msra.mxu0 %v1510_v6  ;;  %1425 = vmatpush3.bf16.msra.mxu1 %v1510_v6 }
  0x6d   : > { %1375 = vmatprep.subr.bf16.mxu0 %v1511_v7  ;;  %1418 = vmatprep.subr.bf16.mxu1 %v1511_v7 }
  0x70   : > { %1376 = vmatpush3.bf16.msra.mxu0 %v1511_v7  ;;  %1426 = vmatpush3.bf16.msra.mxu1 %v1511_v7 }
  0x71   : > { %1377 = vmatprep.subr.bf16.mxu0 %v1512_v8  ;;  %1419 = vmatprep.subr.bf16.mxu1 %v1512_v8 }
  0x74   : > { %1378 = vmatpush3.bf16.msra.mxu0 %v1512_v8  ;;  %1427 = vmatpush3.bf16.msra.mxu1 %v1512_v8 }
  0x75   : > { %1379 = vmatprep.subr.bf16.mxu0 %v1513_v9  ;;  %1420 = vmatprep.subr.bf16.mxu1 %v1513_v9 }
  0x78   : > { %1380 = vmatpush3.bf16.msra.mxu0 %v1513_v9  ;;  %1428 = vmatpush3.bf16.msra.mxu1 %v1513_v9 }
  0x7b   : > { %1382 = vmatmul.mubr.bf16.vlgmr.msra.gmra.mrb[0].mxu0 %v1516_v10  ;;  %1398 = vmatmul.mubr.bf16.vlgmr.msra.gmra.mrb[0].mxu1 %v1517_v11 }
  0x7c   : > { %1385 = vmatprep.mubr.bf16.mxu0 %v1518_v12  ;;  %1401 = vmatprep.mubr.bf16.mxu1 %v1519_v13 }
  0x83   : > { %1386 = vmatmul.mubr.bf16.gmra.mrb[4].mxu0 %v1520_v14  ;;  %1402 = vmatmul.mubr.bf16.gmra.mrb[4].mxu1 %v1521_v15 }
  0x84   : > { %1389 = vmatprep.mubr.bf16.mxu0 %v1522_v16  ;;  %1405 = vmatprep.mubr.bf16.mxu1 %v1523_v17 }
  0x8b   : > { %1390 = vmatmul.mubr.bf16.gmra.mrb[8].mxu0 %v1524_v18  ;;  %1406 = vmatmul.mubr.bf16.gmra.mrb[8].mxu1 %v1525_v19 }
  0x8c   : > { %1393 = vmatprep.mubr.bf16.mxu0 %v1526_v20  ;;  %1409 = vmatprep.mubr.bf16.mxu1 %v1527_v21 }
  0x93   : > { %1394 = vmatmul.mubr.bf16.gmra.mrb[12].mxu0 %v1528_v22  ;;  %1410 = vmatmul.mubr.bf16.gmra.mrb[12].mxu1 %v1529_v23 }
 0x14e   : > { %v1383_v25 = vpop.f32.mrb[0].mxu0  ;;  %v1399_v26 = vpop.f32.mrb[0].mxu1 }
 0x14f   : > { %v786_v27 = vadd.f32 %v1383_v25, %v1895_v24  ;;  %v802_v28 = vadd.f32 %v1399_v26, %v1895_v24  ;;  %v551_v29 = vpop.f32.mrb[1].mxu0  ;;  %v615_v30 = vpop.f32.mrb[1].mxu1 }
 0x150   : > { %v784_v31 = vadd.f32 %v1895_v24, %v551_v29  ;;  %v800_v32 = vadd.f32 %v1895_v24, %v615_v30  ;;  %v1384_v33 = vpop.f32.mrb[2].mxu0  ;;  %v1400_v34 = vpop.f32.mrb[2].mxu1 }
 0x151   : > { %v787_v35 = vadd.f32 %v1384_v33, %v1895_v24  ;;  %v803_v36 = vadd.f32 %v1400_v34, %v1895_v24  ;;  %v554_v37 = vpop.f32.mrb[3].mxu0  ;;  %v618_v38 = vpop.f32.mrb[3].mxu1  ;;  %v818_v41 = vmax.f32 %v786_v27, 0.0  ;;  %v834_v42 = vmax.f32 %v802_v28, 0.0 }
 0x152   : > { %v785_v39 = vadd.f32 %v1895_v24, %v554_v37  ;;  %v801_v40 = vadd.f32 %v1895_v24, %v618_v38  ;;  %v816_v45 = vmax.f32 %v784_v31, 0.0  ;;  %v832_v46 = vmax.f32 %v800_v32, 0.0 }
 0x153   : > { %v819_v43 = vmax.f32 %v787_v35, 0.0  ;;  %v835_v44 = vmax.f32 %v803_v36, 0.0 }
 0x154   : > { %v817_v47 = vmax.f32 %v785_v39, 0.0  ;;  %v833_v48 = vmax.f32 %v801_v40, 0.0 }
 0x155   : > { %v1254_v49 = vpack.c.bf16 %v819_v43, %v818_v41  ;;  %v1294_v50 = vpack.c.bf16 %v835_v44, %v834_v42 }
 0x156   : > { %v1249_v51 = vpack.c.bf16 %v817_v47, %v816_v45  ;;  %v1289_v52 = vpack.c.bf16 %v833_v48, %v832_v46  ;;  %v1387_v53 = vpop.f32.mrb[4].mxu0  ;;  %v1403_v54 = vpop.f32.mrb[4].mxu1 }
 0x157   : > { %1326 = vst [vmem:[%s1907_s24 + $0x8] sm:$0xff] %v1254_v49   ;;  %1334 = vst [vmem:[%s1907_s24 + $0x48] sm:$0xff] %v1294_v50   ;;  %v790_v55 = vadd.f32 %v1387_v53, %v1895_v24  ;;  %v806_v56 = vadd.f32 %v1403_v54, %v1895_v24  ;;  %v567_v57 = vpop.f32.mrb[5].mxu0  ;;  %v631_v58 = vpop.f32.mrb[5].mxu1 }
 0x158   : > { %1250 = vst [vmem:[%s1907_s24] sm:$0xff] %v1249_v51   ;;  %1333 = vst [vmem:[%s1907_s24 + $0x40] sm:$0xff] %v1289_v52   ;;  %v788_v59 = vadd.f32 %v1895_v24, %v567_v57  ;;  %v804_v60 = vadd.f32 %v1895_v24, %v631_v58  ;;  %v1388_v61 = vpop.f32.mrb[6].mxu0  ;;  %v1404_v62 = vpop.f32.mrb[6].mxu1 }
 0x159   : > { %v791_v63 = vadd.f32 %v1388_v61, %v1895_v24  ;;  %v807_v0 = vadd.f32 %v1404_v62, %v1895_v24  ;;  %v570_v1 = vpop.f32.mrb[7].mxu0  ;;  %v634_v2 = vpop.f32.mrb[7].mxu1  ;;  %v822_v5 = vmax.f32 %v790_v55, 0.0  ;;  %v838_v6 = vmax.f32 %v806_v56, 0.0 }
 0x15a   : > { %v789_v3 = vadd.f32 %v1895_v24, %v570_v1  ;;  %v805_v4 = vadd.f32 %v1895_v24, %v634_v2  ;;  %v820_v9 = vmax.f32 %v788_v59, 0.0  ;;  %v836_v10 = vmax.f32 %v804_v60, 0.0 }
 0x15b   : > { %v823_v7 = vmax.f32 %v791_v63, 0.0  ;;  %v839_v8 = vmax.f32 %v807_v0, 0.0 }
 0x15c   : > { %v821_v11 = vmax.f32 %v789_v3, 0.0  ;;  %v837_v12 = vmax.f32 %v805_v4, 0.0 }
 0x15d   : > { %v1264_v13 = vpack.c.bf16 %v823_v7, %v822_v5  ;;  %v1304_v14 = vpack.c.bf16 %v839_v8, %v838_v6 }
 0x15e   : > { %v1259_v15 = vpack.c.bf16 %v821_v11, %v820_v9  ;;  %v1299_v16 = vpack.c.bf16 %v837_v12, %v836_v10  ;;  %v1391_v17 = vpop.f32.mrb[8].mxu0  ;;  %v1407_v18 = vpop.f32.mrb[8].mxu1 }
 0x15f   : > { %1328 = vst [vmem:[%s1907_s24 + $0x18] sm:$0xff] %v1264_v13   ;;  %1336 = vst [vmem:[%s1907_s24 + $0x58] sm:$0xff] %v1304_v14   ;;  %v794_v19 = vadd.f32 %v1391_v17, %v1895_v24  ;;  %v810_v20 = vadd.f32 %v1407_v18, %v1895_v24  ;;  %v583_v21 = vpop.f32.mrb[9].mxu0  ;;  %v647_v22 = vpop.f32.mrb[9].mxu1 }
 0x160   : > { %1327 = vst [vmem:[%s1907_s24 + $0x10] sm:$0xff] %v1259_v15   ;;  %1335 = vst [vmem:[%s1907_s24 + $0x50] sm:$0xff] %v1299_v16   ;;  %v792_v23 = vadd.f32 %v1895_v24, %v583_v21  ;;  %v808_v25 = vadd.f32 %v1895_v24, %v647_v22  ;;  %v1392_v26 = vpop.f32.mrb[10].mxu0  ;;  %v1408_v27 = vpop.f32.mrb[10].mxu1 }
 0x161   : > { %v795_v28 = vadd.f32 %v1392_v26, %v1895_v24  ;;  %v811_v29 = vadd.f32 %v1408_v27, %v1895_v24  ;;  %v586_v30 = vpop.f32.mrb[11].mxu0  ;;  %v650_v31 = vpop.f32.mrb[11].mxu1  ;;  %v826_v34 = vmax.f32 %v794_v19, 0.0  ;;  %v842_v35 = vmax.f32 %v810_v20, 0.0 }
 0x162   : > { %v793_v32 = vadd.f32 %v1895_v24, %v586_v30  ;;  %v809_v33 = vadd.f32 %v1895_v24, %v650_v31  ;;  %v824_v38 = vmax.f32 %v792_v23, 0.0  ;;  %v840_v39 = vmax.f32 %v808_v25, 0.0 }
 0x163   : > { %v827_v36 = vmax.f32 %v795_v28, 0.0  ;;  %v843_v37 = vmax.f32 %v811_v29, 0.0 }
 0x164   : > { %v825_v40 = vmax.f32 %v793_v32, 0.0  ;;  %v841_v41 = vmax.f32 %v809_v33, 0.0 }
 0x165   : > { %v1274_v42 = vpack.c.bf16 %v827_v36, %v826_v34  ;;  %v1314_v43 = vpack.c.bf16 %v843_v37, %v842_v35 }
 0x166   : > { %v1269_v44 = vpack.c.bf16 %v825_v40, %v824_v38  ;;  %v1309_v45 = vpack.c.bf16 %v841_v41, %v840_v39  ;;  %v1395_v46 = vpop.f32.mrb[12].mxu0  ;;  %v1411_v47 = vpop.f32.mrb[12].mxu1 }
 0x167   : > { %1330 = vst [vmem:[%s1907_s24 + $0x28] sm:$0xff] %v1274_v42   ;;  %1338 = vst [vmem:[%s1907_s24 + $0x68] sm:$0xff] %v1314_v43   ;;  %v798_v48 = vadd.f32 %v1395_v46, %v1895_v24  ;;  %v814_v49 = vadd.f32 %v1411_v47, %v1895_v24  ;;  %v599_v50 = vpop.f32.mrb[13].mxu0  ;;  %v663_v51 = vpop.f32.mrb[13].mxu1 }
 0x168   : > { %1329 = vst [vmem:[%s1907_s24 + $0x20] sm:$0xff] %v1269_v44   ;;  %1337 = vst [vmem:[%s1907_s24 + $0x60] sm:$0xff] %v1309_v45   ;;  %v796_v52 = vadd.f32 %v1895_v24, %v599_v50  ;;  %v812_v53 = vadd.f32 %v1895_v24, %v663_v51  ;;  %v1396_v54 = vpop.f32.mrb[14].mxu0  ;;  %v1412_v55 = vpop.f32.mrb[14].mxu1 }
 0x169   : > { %v799_v56 = vadd.f32 %v1396_v54, %v1895_v24  ;;  %v815_v57 = vadd.f32 %v1412_v55, %v1895_v24  ;;  %v602_v58 = vpop.f32.mrb[15].mxu0  ;;  %v666_v59 = vpop.f32.mrb[15].mxu1  ;;  %v830_v62 = vmax.f32 %v798_v48, 0.0  ;;  %v846_v63 = vmax.f32 %v814_v49, 0.0 }
 0x16a   : > { %v797_v60 = vadd.f32 %v1895_v24, %v602_v58  ;;  %v813_v61 = vadd.f32 %v1895_v24, %v666_v59  ;;  %v828_v2 = vmax.f32 %v796_v52, 0.0  ;;  %v844_v3 = vmax.f32 %v812_v53, 0.0 }
 0x16b   : > { %v831_v0 = vmax.f32 %v799_v56, 0.0  ;;  %v847_v1 = vmax.f32 %v815_v57, 0.0 }
 0x16c   : > { %v829_v4 = vmax.f32 %v797_v60, 0.0  ;;  %v845_v5 = vmax.f32 %v813_v61, 0.0 }
 0x16d   : > { %v1284_v6 = vpack.c.bf16 %v831_v0, %v830_v62  ;;  %v1324_v7 = vpack.c.bf16 %v847_v1, %v846_v63 }
 0x16e   : > { %v1279_v24 = vpack.c.bf16 %v829_v4, %v828_v2  ;;  %v1319_v8 = vpack.c.bf16 %v845_v5, %v844_v3 }
 0x16f   : > { %1332 = vst [vmem:[%s1907_s24 + $0x38] sm:$0xff] %v1284_v6   ;;  %1340 = vst [vmem:[%s1907_s24 + $0x78] sm:$0xff] %v1324_v7  }
 0x170   : > { %1331 = vst [vmem:[%s1907_s24 + $0x30] sm:$0xff] %v1279_v24   ;;  %1339 = vst [vmem:[%s1907_s24 + $0x70] sm:$0xff] %v1319_v8  }
 0x171   : > { %1601 = shalt.err (!%p1598_p5)
}
 0x172   : > { %s1602_s6 = scalar_lea.hbm %s1950_s15, 2048  ;;  %s1606_s19 = scalar_lea.hbm %s2007_s3, 8192 }
 0x173   : > { %p1603_p9 = scmp.ne.s32.totalorder %s1950_s15, %s1602_s6  ;;  %p1607_p3 = scmp.lt.u32.totalorder %s1950_s15, %s2007_s3 }
 0x174   : > { %p1608_p7 = scmp.lt.u32.totalorder %s1606_s19, %s1602_s6  ;;  %p1610_p4 = scmp.lt.u32.totalorder %s1602_s6, %s1950_s15 }
 0x175   : > { %p1604_p1 = pnand %p1603_p9, %p1801_p11 }
 0x176   : > { %p1609_p13 = por %p1608_p7, %p1607_p3 }
 0x177   : > { %p1605_p2 = pneg %p1604_p1 }
 0x178   : > { %p1611_p6 = por %p1610_p4, %p1609_p13 }
 0x17a   : > { %p1612_p8 = pnand %p1611_p6, %p1605_p2 }
 0x17c   : > { %1615 = shalt.err (!%p1612_p8)
}
 0x17d   : > { %s1681_s24 = smov 64   ;;  %s1682_s10 = smov 4  }
 0x17e   : > { %1435 = dma.vmem_to_hbm [thread:$0]  (%p1801_p11), %s1952_s11, 2048, %s1950_s15, %s1009_s25, %s1681_s24, %s1681_s24, %s1682_s10  }
 0x17f PF: > { %p1452_p12 = scmp.ge.s32.totalorder %s1674_s17, 2  ;;  %s1038_s9 = sand.u32 1, %s1654_s12  }
 0x180   : > { %p2025_p10 = scmp.ne.s32.totalorder %s2015_s23, 0  ;;  %s1039_s18 = scalar_lea.sflag [#allocation5], %s1038_s9 }
 0x182   : > { %p1446_p0 = pnand %p1452_p12, %p2025_p10 }
 0x184   : > { %1649 = dma.done.wait (!%p1446_p0), %s1039_s18, 2048  }
 0x185   : > { %1651 = vsyncadd (!%p1446_p0), %s1039_s18, 4294965248  ;;  %s20_s17 = sadd.s32 1, %s1674_s17   ;;  %s2026_s12 = smov %s1658_s13 }
 0x186   : > { %p17_p5 = scmp.ge.s32.totalorder %s20_s17, 6   ;;  %s2027_s13 = smov %s1662_s14 }
 0x187   : > { %s2028_s14 = smov %s1810_s5  ;;  %s2029_s15 = smov %s1670_s16 }
 0x188   : > { %s2030_s16 = smov %s2032_s28  ;;  %19 = sbr.rel (!%p17_p5) target bundleno = 7 (0x7), region = 93 }
 0x18f   :  { %1044 = vsyncpa [#allocation4], 1 }
 0x190   :  { %1046 = vsyncpa [#allocation4 + $0x1], 1 }
 0x191   :  { %1047 = vsyncpa [#allocation7], 1 }
 0x192   :  { %1048 = vsyncpa [#allocation5], 1 }
 0x193   :  { %1050 = vsyncpa [#allocation5 + $0x1], 1 }

</bundles_post_ra>
